<compile_context>
chip_gen: v6e
topology: v6e:2x2x1
jax: 0.10.0
libtpu: 0.0.40
codegen_flags: <defaults>
</compile_context>

<pallas_src>
import functools

import jax
import jax.numpy as jnp
from jax import lax
from jax.experimental import pallas as pl
from jax.experimental.pallas import tpu as pltpu


# ---------------------------------------------------------------------------
# Pass 1: per-tile partial sum(|x|)  (parallel grid; XLA finishes the sum)
# ---------------------------------------------------------------------------
def _abs_sum_kernel(x_ref, part_ref, *, tile_rows, true_rows, mask_tail):
    a = jnp.abs(x_ref[...])
    if mask_tail:
        # Static flag: only emitted when B % TB != 0 (ragged last tile).
        # Pallas does not guarantee zeros for out-of-bounds block reads.
        tb, seq = x_ref.shape
        row = lax.broadcasted_iota(jnp.int32, (tb, seq), dimension=0)
        a = jnp.where(pl.program_id(0) * tile_rows + row < true_rows, a, 0.0)
    # Lane-dense (8,128) partial block; wrapper reads [:, 0, 0].
    part_ref[...] = jnp.broadcast_to(jnp.sum(a), part_ref.shape)


# ---------------------------------------------------------------------------
# Pass 2: defended transform only (branch is hoisted to wrapper lax.cond)
# ---------------------------------------------------------------------------
def _defense_kernel(c_ref, x_ref, o_ref):
    # c_ref: (4,) f32 in SMEM -- folded coefficients [1-d0, d1, d2*d3/3, d4]
    x = x_ref[...]                       # (TB, L) f32
    tb, seq = x.shape
    lane = lax.broadcasted_iota(jnp.int32, (tb, seq), dimension=1)

    y = x * c_ref[0]                     # x * (1 - d0)
    y = jnp.where(y < 0, -y * c_ref[1], y)

    # avg_pool1d(kernel=3, stride=1, padding=1, count_include_pad=True):
    # neighbors via XLU rotates; zero the single wrapped lane of each.
    left = jnp.where(lane == 0, 0.0, pltpu.roll(y, shift=1, axis=1))
    right = jnp.where(lane == seq - 1, 0.0, pltpu.roll(y, shift=seq - 1, axis=1))

    # roll commutes with scalar mul: (d2/3) and d3 folded into c_ref[2]
    y = pltpu.roll(left + y + right, shift=1, axis=1) * c_ref[2]

    # where(y < 0, |y| * d4, y)  ==  where(y < 0, -y * d4, y)
    o_ref[...] = jnp.where(y < 0, -y * c_ref[3], y)


# ---------------------------------------------------------------------------
# Wrapper
# ---------------------------------------------------------------------------
def _vmem_budget_bytes():
    """Generation-aware scoped-VMEM limit (half physical, <= 64 MiB)."""
    try:
        cap = int(pltpu.get_tpu_info().vmem_capacity_bytes)
    except Exception:
        cap = 64 << 20  # conservative fallback (v7x per-core physical VMEM)
    return int(min(cap // 2, 64 << 20))


def _batch_tile(batch, seq, vmem_limit):
    """Batch tile: ~8 MiB f32 blocks, keeping 4*block (+headroom) <= vmem_limit."""
    target = min(8 << 20, vmem_limit // 5)    # in+out double-buffered = 4 blocks live
    rows = max(8, target // (seq * 4))
    rows = min(rows, 8192)
    rows -= rows % 8
    rows = max(rows, 8)
    # If one tile covers the whole batch, use the full dim (no padding needed,
    # full-dim blocks are exempt from the multiple-of-8 rule).
    return batch if rows >= batch else rows


def defense_mechanisms(x, anxiety_threshold, defense_strengths):
    """x: (B, L) f32; anxiety_threshold: scalar/(1,) f32; defense_strengths: (5,) f32."""
    x = jnp.asarray(x, jnp.float32)
    B, L = x.shape
    thr = jnp.asarray(anxiety_threshold, jnp.float32).reshape(())
    d = jnp.asarray(defense_strengths, jnp.float32)

    vmem_limit = _vmem_budget_bytes()
    TB = _batch_tile(B, L, vmem_limit)
    num_tiles = pl.cdiv(B, TB)

    cparams = pltpu.CompilerParams(
        dimension_semantics=("parallel",),       # independent batch tiles / megacore
        vmem_limit_bytes=vmem_limit,
    )

    # ---- pass 1: per-tile partial sum(|x|); tiny XLA finish (tree-safe) ----
    partials = pl.pallas_call(
        functools.partial(
            _abs_sum_kernel, tile_rows=TB, true_rows=B, mask_tail=(B % TB != 0)
        ),
        out_shape=jax.ShapeDtypeStruct((num_tiles, 8, 128), jnp.float32),
        grid=(num_tiles,),
        in_specs=[pl.BlockSpec((TB, L), lambda i: (i, 0))],
        out_specs=pl.BlockSpec((1, 8, 128), lambda i: (i, 0, 0)),
        compiler_params=cparams,
    )(x)
    anxiety = jnp.sum(partials[:, 0, 0]) / (B * L)

    # fold scalar constants once, wrapper-side (scalar math, free)
    coeffs = jnp.stack(
        [1.0 - d[0], d[1], d[2] * d[3] * (1.0 / 3.0), d[4]]
    ).astype(jnp.float32)

    # ---- pass 2: defended transform, only executed when the branch is taken ----
    def _defended(xx, cc):
        return pl.pallas_call(
            _defense_kernel,
            out_shape=jax.ShapeDtypeStruct((B, L), jnp.float32),
            grid=(num_tiles,),
            in_specs=[
                pl.BlockSpec(memory_space=pltpu.MemorySpace.SMEM),  # coeffs (4,) f32
                pl.BlockSpec((TB, L), lambda i: (i, 0)),            # x tile
            ],
            out_specs=pl.BlockSpec((TB, L), lambda i: (i, 0)),
            compiler_params=cparams,
        )(cc, xx)

    def _passthrough(xx, cc):
        return xx

    return lax.cond(anxiety > thr, _defended, _passthrough, x, coeffs)


# ---------------------------------------------------------------------------
# Pure-JAX reference (mirrors the PyTorch forward) for validation
# ---------------------------------------------------------------------------
def reference(x, thr, d):
    anxiety = jnp.mean(jnp.abs(x))
    y = x * (1.0 - d[0])
    y = jnp.where(y < 0, -y * d[1], y)
    yp = jnp.pad(y, ((0, 0), (1, 1)))
    y = (yp[:, :-2] + yp[:, 1:-1] + yp[:, 2:]) / 3.0
    y = y * d[2]
    y = jnp.roll(y, 1, axis=-1) * d[3]
    y = jnp.where(y < 0, jnp.abs(y) * d[4], y)
    return jnp.where(anxiety > jnp.asarray(thr, jnp.float32).reshape(())[()], y, x)


if __name__ == "__main__":
    key = jax.random.PRNGKey(0)

    # Small shapes consistent with the module's 2-D (batch, seq) input
    B, L = 8, 128
    x = jax.random.normal(key, (B, L), dtype=jnp.float32)

    # Deterministic parameter init, same as the module's __init__
    anxiety_threshold = jnp.array([0.7], dtype=jnp.float32)
    defense_strengths = jnp.ones((5,), dtype=jnp.float32) / 5.0

    out = defense_mechanisms(x, anxiety_threshold, defense_strengths)
    out = jax.block_until_ready(out)
    ref = reference(x, anxiety_threshold, defense_strengths)
    assert out.shape == x.shape and out.dtype == x.dtype
    assert jnp.allclose(out, ref, atol=1e-5, rtol=1e-5), "mismatch (defended path)"

    # also exercise the not-triggered (pass-through) branch
    hi_thr = jnp.array([10.0], dtype=jnp.float32)
    out2 = jax.block_until_ready(
        defense_mechanisms(x, hi_thr, defense_strengths)
    )
    ref2 = reference(x, hi_thr, defense_strengths)
    assert jnp.allclose(out2, ref2, atol=1e-5, rtol=1e-5), "mismatch (pass-through)"

    # ragged-batch path (non-multiple-of-tile tail, exercises pass-1 masking)
    B3 = 10
    x3 = jax.random.normal(jax.random.PRNGKey(1), (B3, L), dtype=jnp.float32)
    out3 = jax.block_until_ready(
        defense_mechanisms(x3, anxiety_threshold, defense_strengths)
    )
    ref3 = reference(x3, anxiety_threshold, defense_strengths)
    assert jnp.allclose(out3, ref3, atol=1e-5, rtol=1e-5), "mismatch (ragged batch)"

    print("KERNEL_OK")
</pallas_src>

<mosaic_0001>
module attributes {stable_mosaic.version = 11 : i64} {
  func.func @_abs_sum_kernel(%arg0: i32, %arg1: memref<8x128xf32, #tpu.memory_space<vmem>>, %arg2: memref<1x8x128xf32, #tpu.memory_space<vmem>>) attributes {dimension_semantics = [#tpu.dimension_semantics<parallel>], iteration_bounds = array<i64: 1>, scalar_prefetch = 0 : i64, scratch_operands = 0 : i64, tpu.core_type = #tpu.core_type<tc>, window_params = [{transform_indices = @transform_0, window_bounds = array<i64: 8, 128>}, {transform_indices = @transform_1, window_bounds = array<i64: 1, 8, 128>}]} {
    %c0 = arith.constant 0 : index
    %c0_0 = arith.constant 0 : index
    %0 = vector.load %arg1[%c0, %c0_0] : memref<8x128xf32, #tpu.memory_space<vmem>>, vector<8x128xf32>
    %1 = math.absf %0 : vector<8x128xf32>
    %2 = vector.shape_cast %1 : vector<8x128xf32> to vector<1x8x128xf32>
    %cst = arith.constant dense<0.000000e+00> : vector<1xf32>
    %3 = vector.multi_reduction <add>, %2, %cst [1, 2] : vector<1x8x128xf32> to vector<1xf32>
    %4 = vector.shape_cast %3 : vector<1xf32> to vector<1x1x1xf32>
    %5 = vector.extract %4[0, 0, 0] : f32 from vector<1x1x1xf32>
    %6 = vector.broadcast %5 : f32 to vector<1x8x128xf32>
    %c0_1 = arith.constant 0 : index
    %c0_2 = arith.constant 0 : index
    %c0_3 = arith.constant 0 : index
    %7 = vector.load %arg2[%c0_1, %c0_2, %c0_3] : memref<1x8x128xf32, #tpu.memory_space<vmem>>, vector<1x8x128xf32>
    tpu.vector_store %arg2[%c0_1, %c0_2, %c0_3], %6 {strides = array<i32>} : memref<1x8x128xf32, #tpu.memory_space<vmem>>, vector<1x8x128xf32>,
    return
  }
  func.func @transform_0(%arg0: i32) -> (i32, i32) {
    %c0_i32 = arith.constant 0 : i32
    %c0_i32_0 = arith.constant 0 : i32
    return %arg0, %c0_i32 : i32, i32
  }
  func.func @transform_1(%arg0: i32) -> (i32, i32, i32) {
    %c0_i32 = arith.constant 0 : i32
    %c0_i32_0 = arith.constant 0 : i32
    %c0_i32_1 = arith.constant 0 : i32
    return %arg0, %c0_i32, %c0_i32_0 : i32, i32, i32
  }
}

</mosaic_0001>

<bundles_post_ra>
// kernel: tpu_custom_call.1
= control target key start
LH: loop header
LB: loop body
LE: loop exit
PB: predicated region body
PF: predicated region fallthrough
CT: control target
= control target key end

     0   :  { %6 = vsyncpa [#allocation3], 0  ;;  %s115_s0 = inlined_call_operand.hbm [shape: f32[8,128], index: 0, kind: input, shape index: {}]   ;;  %s116_s1 = inlined_call_operand.hbm [shape: f32[1,8,128], index: 1, kind: output, shape index: {}]  }
   0x1   :  { %7 = vsyncpa [#allocation4], 0  ;;  %s97_s6 = smov [#allocation2]  }
   0x2   :  { %s14_s7 = sshll.u32 %s97_s6, 4  ;;  %s15_s7 = int_to_ptr.vmem [resolvable:$true] %s14_s7 }
   0x3   :  { %s61_s8 = scalar_lea.vmem %s15_s7, 128  ;;  %p66_p1 = scmp.lt.s32.totalorder %s15_s7, %s15_s7 }
   0x4   :  { %p62_p0 = scmp.ne.s32.totalorder %s15_s7, %s61_s8  ;;  %p67_p2 = scmp.lt.s32.totalorder %s61_s8, %s61_s8 }
   0x6   :  { %p68_p3 = por %p67_p2, %p66_p1 }
   0x8   :  { %p69_p4 = pnand %p68_p3, %p62_p0 }
   0xa   :  { %72 = shalt.err (!%p69_p4)
}
   0xb   :  { %17 = dma.hbm_to_vmem [thread:$0]  %s115_s0, 128, %s15_s7, [#allocation3]  }
   0xc   :  { %93 = dma.done.wait [#allocation3], 128  }
   0xd   :  { %94 = vsyncadd [#allocation3], 4294967168  ;;  %v21_v0 = vld [vmem:[#allocation2] sm:$0xff]  ;;  %s98_s11 = smov [#allocation5]  }
   0xe   :  { %v22_v1 = vand.u32 2147483647, %v21_v0  ;;  %s40_s12 = sshll.u32 %s98_s11, 4  ;;  %s41_s12 = int_to_ptr.vmem [resolvable:$true] %s40_s12 }
   0xf   :  { %s73_s0 = scalar_lea.vmem %s41_s12, 128  ;;  %p78_p6 = scmp.lt.s32.totalorder %s41_s12, %s41_s12 }
  0x10   :  { %23 = vadd.xlane.f32.xlu0 %v22_v1  ;;  %p74_p5 = scmp.ne.s32.totalorder %s41_s12, %s73_s0  ;;  %p79_p7 = scmp.lt.s32.totalorder %s73_s0, %s73_s0 }
  0x12   :  { %p80_p8 = por %p79_p7, %p78_p6 }
  0x14   :  { %p81_p9 = pnand %p80_p8, %p74_p5 }
  0x99   :  { %v24_v2 = vpop.xlane.xlu0 %23 }
  0x9a   :  { %v25_v3 = vrot.slane %v24_v2, 4 }
  0x9c   :  { %v26_v4 = vadd.f32 %v25_v3, %v24_v2 }
  0x9e   :  { %v27_v5 = vrot.slane %v26_v4, 2 }
  0xa0   :  { %v28_v6 = vadd.f32 %v27_v5, %v26_v4 }
  0xa2   :  { %v29_v7 = vrot.slane %v28_v6, 1 }
  0xa4   :  { %v30_v8 = vadd.f32 %v29_v7, %v28_v6 }
  0xa6   :  { %49 = vpush %v30_v8 }
  0xd7   :  { %s50_s13 = spop %49 }
  0xd8   :  { %v32_v9 = vstv %s50_s13 }
  0xd9   :  { %33 = vst [vmem:[#allocation5] sm:$0xff] %v32_v9 }
  0xda   :  { %84 = shalt.err (!%p81_p9)
}
  0xdb   :  { %43 = dma.vmem_to_hbm [thread:$0]  %s41_s12, 128, %s116_s1, [#allocation4]  }
  0xdc   :  { %95 = dma.done.wait [#allocation4], 128  }
  0xdd   :  { %96 = vsyncadd [#allocation4], 4294967168 }
  0xde   :  { %47 = vsyncpa [#allocation3], 1 }
  0xdf   :  { %48 = vsyncpa [#allocation4], 1 }

</bundles_post_ra>
